<compile_context>
chip_gen: v6e
topology: v6e:2x2x1
jax: 0.10.0
libtpu: 0.0.40
codegen_flags: <defaults>
</compile_context>

<pallas_src>
import functools

import jax
import jax.numpy as jnp
from jax.experimental import pallas as pl
from jax.experimental.pallas import tpu as pltpu


def create_positional_encoding(seq_len: int, d_model: int) -> jnp.ndarray:
    """Same math as PositionalEncoding.create_positional_encoding."""
    pos = jnp.arange(seq_len, dtype=jnp.float32)[:, None]                  # (S, 1)
    div_term = jnp.power(
        10000.0, jnp.arange(0, d_model, 2, dtype=jnp.float32) / d_model
    )                                                                      # (D/2,)
    pe = jnp.zeros((seq_len, d_model), dtype=jnp.float32)
    pe = pe.at[:, 0::2].set(jnp.sin(pos / div_term))
    pe = pe.at[:, 1::2].set(jnp.cos(pos / div_term))
    return pe


def _pe_dropout_kernel(seed_ref, x_ref, pe_ref, o_ref, *,
                       keep_threshold, dropout_rate, training,
                       row_tile, n_cols):
    # x_ref / pe_ref / o_ref: (row_tile, n_cols); the batch dim of x/o is
    # squeezed out of the block, so the add is a plain elementwise add with no
    # per-block broadcast.
    y = x_ref[...] + pe_ref[...]

    if training and dropout_rate > 0.0:
        r = pl.program_id(0)
        b = pl.program_id(1)

        # Per-batch seed (scalar hash chain; scalar unit, not VALU).  Folding
        # b into the seed instead of the element id keeps the per-element
        # counter within one (S*D) slab -> no int32 wrap over B*S*D.
        seed_b = seed_ref[0].astype(jnp.uint32) ^ (
            (b.astype(jnp.uint32) + jnp.uint32(1)) * jnp.uint32(0x9E3779B9))
        seed_b = (seed_b ^ (seed_b >> 16)) * jnp.uint32(0x85EBCA6B)

        # Unique element counter within a batch slab.
        rows = jax.lax.broadcasted_iota(jnp.int32, y.shape, 0)
        cols = jax.lax.broadcasted_iota(jnp.int32, y.shape, 1)
        gid = ((r * row_tile + rows) * n_cols + cols).astype(jnp.uint32)

        # Two-round mul/xorshift mixer, uint32 throughout: logical shifts need
        # no sign masks and the keep decision is one unsigned compare against
        # a 32-bit threshold (no & 0xFFFFFF, no int->float convert).
        h = gid ^ seed_b
        h = h * jnp.uint32(0x7FEB352D)
        h = h ^ (h >> 15)
        h = h * jnp.uint32(0x846CA68B)
        h = h ^ (h >> 16)
        keep = h >= jnp.uint32(keep_threshold)        # P(drop) == dropout_rate

        scale = jnp.asarray(1.0 / (1.0 - dropout_rate), dtype=y.dtype)
        y = jnp.where(keep, y * scale, jnp.zeros_like(y))

    o_ref[...] = y.astype(o_ref.dtype)


def positional_encoding_forward(
    x: jnp.ndarray,
    pos_encoding: jnp.ndarray,
    *,
    dropout_rate: float = 0.0,
    training: bool = False,
    seed: int = 0,
) -> jnp.ndarray:
    B, S, D = x.shape

    # Module semantics: regrow the sinusoidal table if the sequence outgrew it
    # (wrapper-side parameter setup, like the PyTorch buffer re-registration).
    if S > pos_encoding.shape[0]:
        pos_encoding = create_positional_encoding((S // 250 + 1) * 250, D)

    pe = pos_encoding[:S, :].astype(x.dtype)   # crop + match dtype

    if training and dropout_rate >= 1.0:
        return jnp.zeros_like(x)               # nn.Dropout(p=1.0) semantics

    # ---- lane-dense view ----------------------------------------------------
    # Pad D up to a multiple of 128 only when S*D is not 128-divisible, so the
    # flat (R, C) view always gets a lane width that is a multiple of 128
    # (unmasked full-lane stores instead of vst.msk partial stores).
    if (S * D) % 128 != 0:
        d_pad = (-D) % 128
        x_w = jnp.pad(x, ((0, 0), (0, 0), (0, d_pad)))
        pe_w = jnp.pad(pe, ((0, 0), (0, d_pad)))
        D_eff = D + d_pad
    else:
        x_w, pe_w, D_eff = x, pe, D

    total = S * D_eff
    C = D_eff
    for cand in (8192, 4096, 2048, 1024, 512, 256, 128):
        if total % cand == 0:
            C = cand
            break
    R = total // C
    x3 = x_w.reshape(B, R, C)
    pe2 = pe_w.reshape(R, C)

    # ---- generation-aware tile size ------------------------------------------
    itemsize = jnp.dtype(x.dtype).itemsize
    try:
        vmem_cap = pltpu.get_tpu_info().vmem_capacity_bytes
    except Exception:
        vmem_cap = 64 * 1024 * 1024                    # conservative (v7x-like)
    # ~4 MiB blocks on 128 MiB-VMEM parts (v5e/v6e), ~2 MiB on v7x (64 MiB).
    block_budget = (4 << 20) if vmem_cap >= (100 << 20) else (2 << 20)
    # 3 arrays x 2 pipeline buffers x block must fit the scoped-VMEM limit
    # (v5e default scoped VMEM is 16 MiB -> must be raised for 4 MiB blocks).
    vmem_limit = 8 * block_budget

    # ---- row tile: multiple of the dtype's sublane pack -----------------------
    pack = {4: 8, 2: 16, 1: 32}.get(itemsize, 8)
    max_rows = max(pack, block_budget // (C * itemsize))
    if R <= max_rows:
        tR = R                     # full extent: no (8,128) divisibility needed
    else:
        tR = max(pack, (max_rows // pack) * pack)
    nR = (R + tR - 1) // tR

    thr = int(round(float(dropout_rate) * (1 << 32)))
    thr = max(0, min((1 << 32) - 1, thr))

    kernel = functools.partial(
        _pe_dropout_kernel,
        keep_threshold=thr,
        dropout_rate=float(dropout_rate),
        training=bool(training),
        row_tile=tR, n_cols=C,
    )

    # Grid = (nR, B) with batch innermost: pe's block index (r, 0) is constant
    # across consecutive inner steps, so Pallas skips its re-DMA and pe is
    # streamed from HBM exactly once total (not once per batch).
    grid_spec = pltpu.PrefetchScalarGridSpec(
        num_scalar_prefetch=1,                                   # dropout seed in SMEM
        grid=(nR, B),
        in_specs=[
            pl.BlockSpec((None, tR, C), lambda r, b, seed: (b, r, 0)),  # x
            pl.BlockSpec((tR, C), lambda r, b, seed: (r, 0)),           # pos enc
        ],
        out_specs=pl.BlockSpec((None, tR, C), lambda r, b, seed: (b, r, 0)),
    )

    out3 = pl.pallas_call(
        kernel,
        out_shape=jax.ShapeDtypeStruct((B, R, C), x.dtype),
        grid_spec=grid_spec,
        compiler_params=pltpu.CompilerParams(
            # Row axis shards across TensorCores (megacore); the inner batch
            # axis stays serial per core so the constant pe block index keeps
            # the re-fetch-skip intact.
            dimension_semantics=("parallel", "arbitrary"),
            vmem_limit_bytes=vmem_limit,
        ),
    )(jnp.asarray([seed], dtype=jnp.int32), x3, pe2)

    out = out3.reshape(B, S, D_eff)
    if D_eff != D:
        out = out[:, :, :D]
    return out


if __name__ == "__main__":
    d_model = 32
    seq_len = 8
    batch = 2
    dropout = 0.1

    # Module "parameters": the (non-persistent) sinusoidal buffer.
    pos_encoding = create_positional_encoding(seq_len, d_model)

    key = jax.random.PRNGKey(0)
    x = jax.random.normal(key, (batch, seq_len, d_model), dtype=jnp.float32)

    # Eval-mode forward (dropout is identity), matching module.eval() semantics.
    out = positional_encoding_forward(
        x, pos_encoding, dropout_rate=dropout, training=False
    )
    out = jax.block_until_ready(out)

    ref = x + pos_encoding[None, :seq_len, :]
    assert jnp.allclose(out, ref, atol=1e-6), "eval-mode mismatch vs reference"

    # Training-mode forward: every output element must be either dropped (0) or
    # scaled by 1/(1-p); also require that some (but not most) were dropped.
    out_train = positional_encoding_forward(
        x, pos_encoding, dropout_rate=dropout, training=True, seed=1234
    )
    out_train = jax.block_until_ready(out_train)
    scale = 1.0 / (1.0 - dropout)
    consistent = (out_train == 0) | jnp.isclose(
        out_train, ref * scale, rtol=1e-5, atol=1e-5
    )
    assert bool(jnp.all(consistent)), "training-mode dropout output inconsistent"
    drop_frac = float(jnp.mean((out_train == 0.0).astype(jnp.float32)))
    assert 0.0 < drop_frac < 0.5, f"unexpected drop fraction {drop_frac}"

    print("KERNEL_OK")
</pallas_src>

<mosaic_0001>
module attributes {stable_mosaic.version = 11 : i64} {
  func.func @_pe_dropout_kernel(%arg0: i32, %arg1: i32, %arg2: memref<1xi32, #tpu.memory_space<smem>>, %arg3: memref<1x1x256xf32, #tpu.memory_space<vmem>>, %arg4: memref<1x256xf32, #tpu.memory_space<vmem>>, %arg5: memref<1x1x256xf32, #tpu.memory_space<vmem>>) attributes {dimension_semantics = [#tpu.dimension_semantics<parallel>, #tpu.dimension_semantics<arbitrary>], iteration_bounds = array<i64: 1, 2>, scalar_prefetch = 1 : i64, scratch_operands = 0 : i64, tpu.core_type = #tpu.core_type<tc>, window_params = [{transform_indices = @transform_0, window_bounds = array<i64: 1, 1, 256>}, {transform_indices = @transform_1, window_bounds = array<i64: 1, 256>}, {transform_indices = @transform_2, window_bounds = array<i64: 1, 1, 256>}]} {
    %c0 = arith.constant 0 : index
    %c0_0 = arith.constant 0 : index
    %c0_1 = arith.constant 0 : index
    %0 = vector.load %arg3[%c0, %c0_0, %c0_1] : memref<1x1x256xf32, #tpu.memory_space<vmem>>, vector<1x1x256xf32>
    %1 = vector.shape_cast %0 : vector<1x1x256xf32> to vector<1x256xf32>
    %c0_2 = arith.constant 0 : index
    %c0_3 = arith.constant 0 : index
    %2 = vector.load %arg4[%c0_2, %c0_3] : memref<1x256xf32, #tpu.memory_space<vmem>>, vector<1x256xf32>
    %3 = arith.addf %1, %2 : vector<1x256xf32>
    %c0_4 = arith.constant 0 : index
    %c0_5 = arith.constant 0 : index
    %c0_6 = arith.constant 0 : index
    %4 = vector.load %arg5[%c0_4, %c0_5, %c0_6] : memref<1x1x256xf32, #tpu.memory_space<vmem>>, vector<1x1x256xf32>
    %5 = vector.shape_cast %4 : vector<1x1x256xf32> to vector<1x256xf32>
    %6 = vector.shape_cast %3 : vector<1x256xf32> to vector<1x1x256xf32>
    tpu.vector_store %arg5[%c0_4, %c0_5, %c0_6], %6 {strides = array<i32>} : memref<1x1x256xf32, #tpu.memory_space<vmem>>, vector<1x1x256xf32>,
    return
  }
  func.func @transform_0(%arg0: i32, %arg1: i32, %arg2: memref<1xi32, #tpu.memory_space<smem>>) -> (i32, i32, i32) {
    %c0_i32 = arith.constant 0 : i32
    %c0_i32_0 = arith.constant 0 : i32
    return %arg1, %arg0, %c0_i32 : i32, i32, i32
  }
  func.func @transform_1(%arg0: i32, %arg1: i32, %arg2: memref<1xi32, #tpu.memory_space<smem>>) -> (i32, i32) {
    %c0_i32 = arith.constant 0 : i32
    %c0_i32_0 = arith.constant 0 : i32
    return %arg0, %c0_i32 : i32, i32
  }
  func.func @transform_2(%arg0: i32, %arg1: i32, %arg2: memref<1xi32, #tpu.memory_space<smem>>) -> (i32, i32, i32) {
    %c0_i32 = arith.constant 0 : i32
    %c0_i32_0 = arith.constant 0 : i32
    return %arg1, %arg0, %c0_i32 : i32, i32, i32
  }
}

</mosaic_0001>

<bundles_post_ra>
// kernel: tpu_custom_call.1
= control target key start
LH: loop header
LB: loop body
LE: loop exit
PB: predicated region body
PF: predicated region fallthrough
CT: control target
= control target key end

     0   :  { %9 = vsyncpa [#allocation5], 0  ;;  %s670_s0 = inlined_call_operand.<no memory space> [shape: s32[1], index: 0, kind: input, shape index: {}]   ;;  %s671_s1 = inlined_call_operand.hbm [shape: f32[2,1,256], index: 1, kind: input, shape index: {}]   ;;  %s672_s2 = inlined_call_operand.vmem [shape: f32[1,256], index: 2, kind: input, shape index: {}]   ;;  %s673_s3 = inlined_call_operand.hbm [shape: f32[2,1,256], index: 3, kind: output, shape index: {}]  }
   0x1   :  { %11 = vsyncpa [#allocation5 + $0x1], 0 }
   0x2   :  { %12 = vsyncpa [#allocation6], 0 }
   0x3   :  { %14 = vsyncpa [#allocation6 + $0x1], 0  ;;  %s533_s12 = smov 0   ;;  %s535_s13 = smov 0  }
   0x4   :  { %s537_s14 = smov 0   ;;  %s539_s0 = smov 0  }
   0x5   :  { %s541_s15 = smov 0   ;;  %s543_s16 = smov 0  }
   0x6 LB: > { %s321_s17 = sadd.s32 4294967295, %s509_s16   ;;  %s322_s18 = sadd.s32 4294967294, %s509_s16   ;;  %s509_s16 = sphi %s543_s16, %s20_s16   ;;  %s505_s15 = sphi %s541_s15, %s685_s15   ;;  %s501_s0 = sphi %s539_s0, %s684_s0   ;;  %s497_s14 = sphi %s537_s14, %s683_s14   ;;  %s493_s13 = sphi %s535_s13, %s682_s13   ;;  %s489_s12 = sphi %s533_s12, %s681_s12  }
   0x7   : > { %s29_s19 = sadd.s32 1, %s505_s15  ;;  %s41_s20 = sadd.s32 1, %s497_s14 }
   0x8   : > { %p30_p0 = scmp.ge.s32.totalorder %s29_s19, 2  ;;  %p48_p1 = scmp.ne.s32.totalorder %s497_s14, %s493_s13 }
   0x9   : > { %p49_p2 = scmp.eq.s32.totalorder %s509_s16, 0  ;;  %p54_p3 = scmp.ne.s32.totalorder %s493_s13, %s489_s12 }
   0xa   : > { %s687_s19 = smov (%p30_p0, %s29_s19), 0  ;;  %p55_p5 = scmp.eq.s32.totalorder %s321_s17, 0 }
   0xb   : > { %p574_p4 = por %p49_p2, %p48_p1  ;;  %s36_s22 = ssub.s32 %s505_s15, %s687_s19 }
   0xc   : > { %p106_p6 = scmp.eq.s32.totalorder %s321_s17, 1  ;;  %p39_p7 = scmp.eq.s32.totalorder %s36_s22, 0 }
   0xd   : > { %p580_p8 = por %p55_p5, %p54_p3  ;;  %p112_p10 = scmp.eq.s32.totalorder %s322_s18, 1 }
   0xe   : > { %p584_p9 = por %p106_p6, %p48_p1  ;;  %p351_p13 = scmp.lt.s32.totalorder %s509_s16, 2 }
   0xf   : > { %s589_s25 = scalar_select %p39_p7, %s497_s14, %s41_s20  }
  0x10   : > { %p591_p11 = por %p112_p10, %p54_p3  ;;  %s139_s27 = sand.u32 1, %s497_s14  }
  0x11   : > { %s326_s28 = sshll.u32 %s139_s27, 1  ;;  %s337_s29 = sshll.u32 %s505_s15, 5 }
  0x12   : > { %s677_s26 = scalar_select %p591_p11, 1, 0 }
  0x13   : > { %s151_s5 = scalar_lea.hbm %s671_s1, %s337_s29  ;;  %s143_s6 = scalar_lea.vmem [#allocation4], %s326_s28 }
  0x14   : > { %s153_s7 = sshll.u32 %s143_s6, 4  ;;  %p604_p0 = pnand %p351_p13, %p574_p4  ;;  %s154_s7 = int_to_ptr.vmem [resolvable:$true] %s153_s7 }
  0x15   : > { %p329_p1 = scmp.ge.s32.totalorder %s509_s16, 1  ;;  %p158_p2 = scmp.lt.s32.totalorder %s509_s16, 3 }
  0x16   : > { %s140_s9 = scalar_lea.sflag [#allocation5], %s139_s27  ;;  %p403_p3 = pneg %p604_p0 }
  0x17   : > { %s414_s10 = scalar_lea.vmem %s154_s7, 32  ;;  %s511_s11 = smov [#allocation4]  }
  0x18   : > { %p415_p5 = scmp.ne.s32.totalorder %s154_s7, %s414_s10  ;;  %s419_s17 = sshll.u32 %s511_s11, 4  ;;  %s420_s17 = int_to_ptr.vmem [resolvable:$false] %s419_s17 }
  0x19   : > { %s421_s18 = scalar_lea.vmem %s420_s17, 64  ;;  %p422_p10 = scmp.lt.s32.totalorder %s154_s7, %s420_s17 }
  0x1a   : > { %p417_p6 = pnand %p415_p5, %p403_p3  ;;  %p423_p12 = scmp.lt.s32.totalorder %s421_s18, %s414_s10 }
  0x1c   : > { %p418_p7 = pneg %p417_p6  ;;  %p424_p4 = por %p423_p12, %p422_p10 }
  0x1e   : > { %p425_p13 = pnand %p424_p4, %p418_p7 }
  0x20   : > { %428 = shalt.err (!%p425_p13)
}
  0x21   : > { %346 = dma.hbm_to_vmem [thread:$0]  (!%p604_p0), %s151_s5, 32, %s154_s7, %s140_s9  }
  0x22   : > { %p159_p11 = pnand %p329_p1, %p158_p2 }
  0x23   : > { %s619_s20 = sand.u32 (!%p159_p11), 1, %s493_s13  }
  0x24   : > { %162 = sbr.rel (%p159_p11) target bundleno = 66 (0x42), region = 28  ;;  %s330_s21 = sshll.u32 (!%p159_p11), %s619_s20, 1 }
  0x25   : > { %s165_s22 = scalar_lea.sflag (!%p159_p11), [#allocation5], %s619_s20  ;;  %s168_s27 = scalar_lea.vmem (!%p159_p11), [#allocation4], %s330_s21 }
  0x29   : > { %480 = dma.done.wait (%p580_p8), %s165_s22, 32  }
  0x2a   : > { %482 = vsyncadd (%p580_p8), %s165_s22, 4294967264  ;;  %v200_v0 = vlaneseq  ;;  %s192_s28 = scalar_lea.vmem [#allocation7], %s330_s21  ;;  %s338_s30 = sshll.u32 %s501_s0, 5  ;;  %v197_v1 = vld [vmem:[%s168_s27] sm:$0x3] }
  0x2b   : > { %s222_s29 = sshll.u32 %s192_s28, 4  ;;  %v198_v2 = vld [vmem:[%s672_s2] sm:$0x3]  ;;  %s220_s23 = scalar_lea.hbm %s673_s3, %s338_s30  ;;  %s223_s29 = int_to_ptr.vmem [resolvable:$true] %s222_s29 }
  0x2c   : > { %vm202_vm0 = vcmp.lt.s32.totalorder %v200_v0, 256  ;;  %v199_v3 = vadd.f32 %v198_v2, %v197_v1  ;;  %s206_s8 = scalar_lea.sflag [#allocation6], %s619_s20  ;;  %s429_s9 = scalar_lea.vmem %s223_s29, 32 }
  0x2d   : > { %p430_p8 = scmp.ne.s32.totalorder %s223_s29, %s429_s9  ;;  %s512_s0 = smov [#allocation7]  }
  0x2e   : > { %204 = vst.msk [vmem:[%s192_s28] sm:$0x3] %vm202_vm0, %v199_v3  ;;  %s433_s10 = sshll.u32 %s512_s0, 4  ;;  %s434_s10 = int_to_ptr.vmem [resolvable:$false] %s433_s10 }
  0x2f   : > { %p431_p11 = pnand %p430_p8, %p584_p9  ;;  %s435_s11 = scalar_lea.vmem %s434_s10, 64 }
  0x30   : > { %p436_p0 = scmp.lt.s32.totalorder %s223_s29, %s434_s10  ;;  %p437_p1 = scmp.lt.s32.totalorder %s435_s11, %s429_s9 }
  0x31   : > { %p432_p12 = pneg %p431_p11 }
  0x32   : > { %p438_p2 = por %p437_p1, %p436_p0 }
  0x34   : > { %p439_p3 = pnand %p438_p2, %p432_p12 }
  0x36   : > { %442 = shalt.err (!%p439_p3)
}
  0x37   : > { %s443_s17 = scalar_lea.hbm %s220_s23, 32  ;;  %s447_s21 = scalar_lea.hbm %s673_s3, 64 }
  0x38   : > { %p444_p5 = scmp.ne.s32.totalorder %s220_s23, %s443_s17  ;;  %p448_p10 = scmp.lt.s32.totalorder %s220_s23, %s673_s3 }
  0x39   : > { %p449_p4 = scmp.lt.s32.totalorder %s447_s21, %s443_s17 }
  0x3a   : > { %p445_p6 = pnand %p444_p5, %p584_p9 }
  0x3b   : > { %p450_p13 = por %p449_p4, %p448_p10 }
  0x3c   : > { %p446_p7 = pneg %p445_p6 }
  0x3e   : > { %p451_p8 = pnand %p450_p13, %p446_p7 }
  0x40   : > { %454 = shalt.err (!%p451_p8)
}
  0x41   : > { %341 = dma.vmem_to_hbm [thread:$0]  (%p584_p9), %s223_s29, 32, %s220_s23, %s206_s8  }
  0x42 PF: > { %s234_s28 = sand.u32 1, %s489_s12   ;;  %p679_p11 = scmp.ne.s32.totalorder %s677_s26, 0 }
  0x43   : > { %p680_p12 = scmp.ge.s32.totalorder %s509_s16, 2  ;;  %s235_s30 = scalar_lea.sflag [#allocation6], %s234_s28 }
  0x45   : > { %p348_p0 = pnand %p680_p12, %p679_p11 }
  0x47   : > { %p349_p1 = pneg %p348_p0 }
  0x49   : > { %484 = dma.done.wait (%p349_p1), %s235_s30, 32  }
  0x4a   : > { %486 = vsyncadd (%p349_p1), %s235_s30, 4294967264  ;;  %s20_s16 = sadd.s32 1, %s509_s16   ;;  %s681_s12 = smov %s493_s13 }
  0x4b   : > { %p17_p2 = scmp.ge.s32.totalorder %s20_s16, 4   ;;  %s682_s13 = smov %s497_s14 }
  0x4c   : > { %s683_s14 = smov %s589_s25  ;;  %s684_s0 = smov %s505_s15 }
  0x4d   : > { %s685_s15 = smov %s687_s19  ;;  %19 = sbr.rel (!%p17_p2) target bundleno = 6 (0x6), region = 76 }
  0x52   :  { %240 = vsyncpa [#allocation5], 1 }
  0x53   :  { %242 = vsyncpa [#allocation5 + $0x1], 1 }
  0x54   :  { %243 = vsyncpa [#allocation6], 1 }
  0x55   :  { %245 = vsyncpa [#allocation6 + $0x1], 1 }

</bundles_post_ra>
